<compile_context>
chip_gen: v7x
topology: tpu7x:2x2x1
jax: 0.10.0
libtpu: 0.0.40
codegen_flags: <defaults>
</compile_context>

<pallas_src>
import jax
import jax.numpy as jnp
from jax.experimental import pallas as pl
from jax.experimental.pallas import tpu as pltpu


def _round_up(n, m):
    return ((n + m - 1) // m) * m


def mlp_sigmoid_kernel(x_ref, w1_ref, b1_ref, w2_ref, b2_ref,
                       w3_ref, b3_ref, w4_ref, b4_ref, o_ref):
    # x tile [TB, F] f32, read straight from HBM (no wrapper-side cast/pad).
    x = x_ref[...]
    h = jnp.dot(x, w1_ref[...], preferred_element_type=jnp.float32)
    h = jnp.maximum(h + b1_ref[...], 0.0)

    h = jnp.dot(h, w2_ref[...], preferred_element_type=jnp.float32)
    h = jnp.maximum(h + b2_ref[...], 0.0)

    h = jnp.dot(h, w3_ref[...], preferred_element_type=jnp.float32)
    h = jnp.maximum(h + b3_ref[...], 0.0)

    # Head Linear(H, 1): N=1 is lane-sparse on the MXU, so transpose once
    # (XLU), multiply by the (H, 1) weight column (VPU), and sublane-reduce to
    # a lane-dense (1, TB) row.  sigmoid runs on the EUP.
    hT = h.T                                             # (H, TB)
    logit = jnp.sum(hT * w4_ref[...], axis=0, keepdims=True) + b4_ref[...]
    o_ref[...] = jax.nn.sigmoid(logit)                   # (1, TB) lane-dense


def logistic_regression_forward(x, params, *, block_b=4096):
    """x: [B, F] float32.  Returns [B] float32 (sigmoid of the final logit)."""
    w1, b1, w2, b2, w3, b3, w4, b4 = params
    B, F = x.shape
    H = w1.shape[1]

    # Tiny, VMEM-resident parameters (f32 throughout; kernel is not MXU-bound).
    w1f = w1.astype(jnp.float32)
    w2f = w2.astype(jnp.float32)
    w3f = w3.astype(jnp.float32)
    b1r = b1.reshape(1, H).astype(jnp.float32)
    b2r = b2.reshape(1, H).astype(jnp.float32)
    b3r = b3.reshape(1, H).astype(jnp.float32)
    w4_col = w4.reshape(H, 1).astype(jnp.float32)
    b4s = b4.reshape(1, 1).astype(jnp.float32)

    # Batch tile: multiple of 256 (lane-dense (1, TB) output store, sublane
    # aligned x block), clamped so the grid keeps ~>=8 steps for v7x's two
    # TensorCores.  If a single tile covers the whole batch, use TB == B so
    # every block equals its full array dims (no masking needed at all).
    block_b = max(256, (block_b // 256) * 256)
    TB = min(block_b, _round_up(pl.cdiv(B, 8), 256))
    if TB >= B:
        TB = B
    num_tiles = pl.cdiv(B, TB)
    Bp = num_tiles * TB  # padded batch extent of the output array only

    def resident(arr):
        # Whole array as one block with a constant index map: stays
        # VMEM-resident across all batch-grid iterations.
        return pl.BlockSpec(arr.shape, lambda i: (0,) * arr.ndim)

    param_bytes = sum(int(p.size) * 4
                      for p in (w1f, b1r, w2f, b2r, w3f, b3r, w4_col, b4s))
    cost = pl.CostEstimate(
        flops=2 * B * (F * H + H * H + H * H + H),
        transcendentals=B,
        bytes_accessed=B * (F + 1) * 4 + param_bytes,
    )

    out = pl.pallas_call(
        mlp_sigmoid_kernel,
        out_shape=jax.ShapeDtypeStruct((1, Bp), jnp.float32),
        grid_spec=pltpu.PrefetchScalarGridSpec(
            num_scalar_prefetch=0,
            grid=(num_tiles,),
            in_specs=[
                pl.BlockSpec((TB, F), lambda i: (i, 0)),
                resident(w1f), resident(b1r),
                resident(w2f), resident(b2r),
                resident(w3f), resident(b3r),
                resident(w4_col), resident(b4s),
            ],
            out_specs=pl.BlockSpec((1, TB), lambda i: (0, i)),
        ),
        compiler_params=pltpu.CompilerParams(
            dimension_semantics=("parallel",)),
        cost_estimate=cost,
    )(x.astype(jnp.float32), w1f, b1r, w2f, b2r, w3f, b3r, w4_col, b4s)

    # torch.sigmoid(...).squeeze(1): take the [B] valid lanes of the (1, Bp) row.
    return out[0, :B]


def init_params(key, n_features, n_hidden=32):
    """Deterministic init matching nn.Linear fan-in bounds; stored as [in, out]."""
    dims = [(n_features, n_hidden), (n_hidden, n_hidden),
            (n_hidden, n_hidden), (n_hidden, 1)]
    params = []
    for (fan_in, fan_out) in dims:
        key, kw, kb = jax.random.split(key, 3)
        bound = 1.0 / jnp.sqrt(jnp.float32(fan_in))
        w = jax.random.uniform(kw, (fan_in, fan_out), jnp.float32, -bound, bound)
        b = jax.random.uniform(kb, (1, fan_out), jnp.float32, -bound, bound)
        params += [w, b]
    return tuple(params)


def reference_forward_f32(x, params):
    """Pure-JAX full-precision reference of the PyTorch module (Dropout p=0)."""
    w1, b1, w2, b2, w3, b3, w4, b4 = params
    h = jnp.maximum(x @ w1 + b1, 0.0)
    h = jnp.maximum(h @ w2 + b2, 0.0)
    h = jnp.maximum(h @ w3 + b3, 0.0)
    return jax.nn.sigmoid(h @ w4 + b4)[:, 0]


if __name__ == "__main__":
    key = jax.random.PRNGKey(0)
    F, H = 16, 32

    key, kp = jax.random.split(key)
    params = init_params(kp, F, H)

    # Case 1: tiny batch -> single exact-fit tile (block == full array dims).
    # Case 2: multi-tile grid with a ragged last tile (600 % 256 != 0),
    #         exercising Pallas's out-of-bounds masking and the lane-dense
    #         (1, TB) output path across several grid steps.
    for B, bb in ((20, 4096), (600, 256)):
        key, kx = jax.random.split(key)
        x = jax.random.normal(kx, (B, F), jnp.float32)

        out = jax.block_until_ready(
            logistic_regression_forward(x, params, block_b=bb))
        ref = reference_forward_f32(x, params)

        assert out.shape == (B,)
        assert jnp.allclose(out, ref, atol=5e-3, rtol=5e-3), (
            B, float(jnp.max(jnp.abs(out - ref))))

    print("KERNEL_OK")
</pallas_src>

<mosaic_0001>
module attributes {stable_mosaic.version = 11 : i64} {
  func.func @mlp_sigmoid_kernel(%arg0: i32, %arg1: memref<20x16xf32, #tpu.memory_space<vmem>>, %arg2: memref<16x32xf32, #tpu.memory_space<vmem>>, %arg3: memref<1x32xf32, #tpu.memory_space<vmem>>, %arg4: memref<32x32xf32, #tpu.memory_space<vmem>>, %arg5: memref<1x32xf32, #tpu.memory_space<vmem>>, %arg6: memref<32x32xf32, #tpu.memory_space<vmem>>, %arg7: memref<1x32xf32, #tpu.memory_space<vmem>>, %arg8: memref<32x1xf32, #tpu.memory_space<vmem>>, %arg9: memref<1x1xf32, #tpu.memory_space<vmem>>, %arg10: memref<1x20xf32, #tpu.memory_space<vmem>>) attributes {dimension_semantics = [#tpu.dimension_semantics<parallel>], iteration_bounds = array<i64: 1>, scalar_prefetch = 0 : i64, scratch_operands = 0 : i64, tpu.core_type = #tpu.core_type<tc>, window_params = [{transform_indices = @transform_0, window_bounds = array<i64: 20, 16>}, {pipeline_mode = #tpu.pipeline_mode<synchronous>, transform_indices = @transform_1, window_bounds = array<i64: 16, 32>}, {pipeline_mode = #tpu.pipeline_mode<synchronous>, transform_indices = @transform_2, window_bounds = array<i64: 1, 32>}, {pipeline_mode = #tpu.pipeline_mode<synchronous>, transform_indices = @transform_3, window_bounds = array<i64: 32, 32>}, {pipeline_mode = #tpu.pipeline_mode<synchronous>, transform_indices = @transform_4, window_bounds = array<i64: 1, 32>}, {pipeline_mode = #tpu.pipeline_mode<synchronous>, transform_indices = @transform_5, window_bounds = array<i64: 32, 32>}, {pipeline_mode = #tpu.pipeline_mode<synchronous>, transform_indices = @transform_6, window_bounds = array<i64: 1, 32>}, {pipeline_mode = #tpu.pipeline_mode<synchronous>, transform_indices = @transform_7, window_bounds = array<i64: 32, 1>}, {pipeline_mode = #tpu.pipeline_mode<synchronous>, transform_indices = @transform_8, window_bounds = array<i64: 1, 1>}, {transform_indices = @transform_9, window_bounds = array<i64: 1, 20>}]} {
    %c0 = arith.constant 0 : index
    %c0_0 = arith.constant 0 : index
    %0 = vector.load %arg1[%c0, %c0_0] : memref<20x16xf32, #tpu.memory_space<vmem>>, vector<20x16xf32>
    %c0_1 = arith.constant 0 : index
    %c0_2 = arith.constant 0 : index
    %1 = vector.load %arg2[%c0_1, %c0_2] : memref<16x32xf32, #tpu.memory_space<vmem>>, vector<16x32xf32>
    %cst = arith.constant dense<0.000000e+00> : vector<20x32xf32>
    %2 = tpu.matmul %0, %1, %cst {dimension_numbers = #tpu.dot_dimension_numbers<[1], [0], [0], [1], [0, 0, 1, 1], [], []>} : vector<20x16xf32>, vector<16x32xf32>, vector<20x32xf32> -> vector<20x32xf32>
    %c0_3 = arith.constant 0 : index
    %c0_4 = arith.constant 0 : index
    %3 = vector.load %arg3[%c0_3, %c0_4] : memref<1x32xf32, #tpu.memory_space<vmem>>, vector<1x32xf32>
    %4 = vector.broadcast %3 : vector<1x32xf32> to vector<20x32xf32>
    %5 = arith.addf %2, %4 : vector<20x32xf32>
    %cst_5 = arith.constant 0.000000e+00 : f32
    %6 = vector.broadcast %cst_5 : f32 to vector<20x32xf32>
    %7 = arith.maximumf %5, %6 : vector<20x32xf32>
    %c0_6 = arith.constant 0 : index
    %c0_7 = arith.constant 0 : index
    %8 = vector.load %arg4[%c0_6, %c0_7] : memref<32x32xf32, #tpu.memory_space<vmem>>, vector<32x32xf32>
    %cst_8 = arith.constant dense<0.000000e+00> : vector<20x32xf32>
    %9 = tpu.matmul %7, %8, %cst_8 {dimension_numbers = #tpu.dot_dimension_numbers<[1], [0], [0], [1], [0, 0, 1, 1], [], []>} : vector<20x32xf32>, vector<32x32xf32>, vector<20x32xf32> -> vector<20x32xf32>
    %c0_9 = arith.constant 0 : index
    %c0_10 = arith.constant 0 : index
    %10 = vector.load %arg5[%c0_9, %c0_10] : memref<1x32xf32, #tpu.memory_space<vmem>>, vector<1x32xf32>
    %11 = vector.broadcast %10 : vector<1x32xf32> to vector<20x32xf32>
    %12 = arith.addf %9, %11 : vector<20x32xf32>
    %cst_11 = arith.constant 0.000000e+00 : f32
    %13 = vector.broadcast %cst_11 : f32 to vector<20x32xf32>
    %14 = arith.maximumf %12, %13 : vector<20x32xf32>
    %c0_12 = arith.constant 0 : index
    %c0_13 = arith.constant 0 : index
    %15 = vector.load %arg6[%c0_12, %c0_13] : memref<32x32xf32, #tpu.memory_space<vmem>>, vector<32x32xf32>
    %cst_14 = arith.constant dense<0.000000e+00> : vector<20x32xf32>
    %16 = tpu.matmul %14, %15, %cst_14 {dimension_numbers = #tpu.dot_dimension_numbers<[1], [0], [0], [1], [0, 0, 1, 1], [], []>} : vector<20x32xf32>, vector<32x32xf32>, vector<20x32xf32> -> vector<20x32xf32>
    %c0_15 = arith.constant 0 : index
    %c0_16 = arith.constant 0 : index
    %17 = vector.load %arg7[%c0_15, %c0_16] : memref<1x32xf32, #tpu.memory_space<vmem>>, vector<1x32xf32>
    %18 = vector.broadcast %17 : vector<1x32xf32> to vector<20x32xf32>
    %19 = arith.addf %16, %18 : vector<20x32xf32>
    %cst_17 = arith.constant 0.000000e+00 : f32
    %20 = vector.broadcast %cst_17 : f32 to vector<20x32xf32>
    %21 = arith.maximumf %19, %20 : vector<20x32xf32>
    %22 = tpu.transpose %21, [1, 0] : vector<20x32xf32> -> vector<32x20xf32>
    %c0_18 = arith.constant 0 : index
    %c0_19 = arith.constant 0 : index
    %23 = vector.load %arg8[%c0_18, %c0_19] : memref<32x1xf32, #tpu.memory_space<vmem>>, vector<32x1xf32>
    %24 = vector.broadcast %23 : vector<32x1xf32> to vector<32x20xf32>
    %25 = arith.mulf %22, %24 : vector<32x20xf32>
    %cst_20 = arith.constant dense<0.000000e+00> : vector<20xf32>
    %26 = vector.multi_reduction <add>, %25, %cst_20 [0] : vector<32x20xf32> to vector<20xf32>
    %27 = vector.shape_cast %26 : vector<20xf32> to vector<1x20xf32>
    %c0_21 = arith.constant 0 : index
    %c0_22 = arith.constant 0 : index
    %28 = vector.load %arg9[%c0_21, %c0_22] : memref<1x1xf32, #tpu.memory_space<vmem>>, vector<1x1xf32>
    %29 = vector.broadcast %28 : vector<1x1xf32> to vector<1x20xf32>
    %30 = arith.addf %27, %29 : vector<1x20xf32>
    %31 = arith.negf %30 : vector<1x20xf32>
    %32 = math.exp %31 : vector<1x20xf32>
    %cst_23 = arith.constant 1.000000e+00 : f32
    %33 = vector.broadcast %cst_23 : f32 to vector<1x20xf32>
    %34 = arith.addf %33, %32 : vector<1x20xf32>
    %35 = arith.divf %33, %34 : vector<1x20xf32>
    %c0_24 = arith.constant 0 : index
    %c0_25 = arith.constant 0 : index
    %36 = vector.load %arg10[%c0_24, %c0_25] : memref<1x20xf32, #tpu.memory_space<vmem>>, vector<1x20xf32>
    tpu.vector_store %arg10[%c0_24, %c0_25], %35 {strides = array<i32>} : memref<1x20xf32, #tpu.memory_space<vmem>>, vector<1x20xf32>,
    return
  }
  func.func @transform_0(%arg0: i32) -> (i32, i32) {
    %c0_i32 = arith.constant 0 : i32
    %c0_i32_0 = arith.constant 0 : i32
    return %arg0, %c0_i32 : i32, i32
  }
  func.func @transform_1(%arg0: i32) -> (i32, i32) {
    %c0_i32 = arith.constant 0 : i32
    %c0_i32_0 = arith.constant 0 : i32
    %c0_i32_1 = arith.constant 0 : i32
    return %c0_i32, %c0_i32_0 : i32, i32
  }
  func.func @transform_2(%arg0: i32) -> (i32, i32) {
    %c0_i32 = arith.constant 0 : i32
    %c0_i32_0 = arith.constant 0 : i32
    %c0_i32_1 = arith.constant 0 : i32
    return %c0_i32, %c0_i32_0 : i32, i32
  }
  func.func @transform_3(%arg0: i32) -> (i32, i32) {
    %c0_i32 = arith.constant 0 : i32
    %c0_i32_0 = arith.constant 0 : i32
    %c0_i32_1 = arith.constant 0 : i32
    return %c0_i32, %c0_i32_0 : i32, i32
  }
  func.func @transform_4(%arg0: i32) -> (i32, i32) {
    %c0_i32 = arith.constant 0 : i32
    %c0_i32_0 = arith.constant 0 : i32
    %c0_i32_1 = arith.constant 0 : i32
    return %c0_i32, %c0_i32_0 : i32, i32
  }
  func.func @transform_5(%arg0: i32) -> (i32, i32) {
    %c0_i32 = arith.constant 0 : i32
    %c0_i32_0 = arith.constant 0 : i32
    %c0_i32_1 = arith.constant 0 : i32
    return %c0_i32, %c0_i32_0 : i32, i32
  }
  func.func @transform_6(%arg0: i32) -> (i32, i32) {
    %c0_i32 = arith.constant 0 : i32
    %c0_i32_0 = arith.constant 0 : i32
    %c0_i32_1 = arith.constant 0 : i32
    return %c0_i32, %c0_i32_0 : i32, i32
  }
  func.func @transform_7(%arg0: i32) -> (i32, i32) {
    %c0_i32 = arith.constant 0 : i32
    %c0_i32_0 = arith.constant 0 : i32
    %c0_i32_1 = arith.constant 0 : i32
    return %c0_i32, %c0_i32_0 : i32, i32
  }
  func.func @transform_8(%arg0: i32) -> (i32, i32) {
    %c0_i32 = arith.constant 0 : i32
    %c0_i32_0 = arith.constant 0 : i32
    %c0_i32_1 = arith.constant 0 : i32
    return %c0_i32, %c0_i32_0 : i32, i32
  }
  func.func @transform_9(%arg0: i32) -> (i32, i32) {
    %c0_i32 = arith.constant 0 : i32
    %c0_i32_0 = arith.constant 0 : i32
    return %c0_i32, %arg0 : i32, i32
  }
}

</mosaic_0001>

<bundles_post_ra>
// kernel: tpu_custom_call.1
= control target key start
LH: loop header
LB: loop body
LE: loop exit
PB: predicated region body
PF: predicated region fallthrough
CT: control target
= control target key end

     0   :  { %s739_s0 = inlined_call_operand.vmem [shape: f32[20,16], index: 0, kind: input, shape index: {}]   ;;  %s740_s1 = inlined_call_operand.vmem [shape: f32[16,32], index: 1, kind: input, shape index: {}]   ;;  %s741_s2 = inlined_call_operand.vmem [shape: f32[1,32], index: 2, kind: input, shape index: {}]   ;;  %s742_s3 = inlined_call_operand.vmem [shape: f32[32,32], index: 3, kind: input, shape index: {}]   ;;  %s743_s4 = inlined_call_operand.vmem [shape: f32[1,32], index: 4, kind: input, shape index: {}]   ;;  %s744_s5 = inlined_call_operand.vmem [shape: f32[32,32], index: 5, kind: input, shape index: {}]   ;;  %s745_s6 = inlined_call_operand.vmem [shape: f32[1,32], index: 6, kind: input, shape index: {}]   ;;  %s746_s7 = inlined_call_operand.vmem [shape: f32[32,1], index: 7, kind: input, shape index: {}]   ;;  %s747_s8 = inlined_call_operand.<no memory space> [shape: f32[1,1], index: 8, kind: input, shape index: {}]   ;;  %s748_s9 = inlined_call_operand.hbm [shape: f32[1,20], index: 9, kind: output, shape index: {}]  }
   0x1   :  { %v14_v0 = vstv %s747_s8 }
   0x2   :  { %15 = vst [vmem:[#allocation2] sm:$0x1] %v14_v0 }
   0x3   :  { %v38_v1 = vld [vmem:[%s740_s1] sm:$0xff]  ;;  %v39_v2 = vld [vmem:[%s740_s1 + $0x8] sm:$0xff]  ;;  %v585_v3 = vmov 0.0|0.0   ;;  %vm586_vm0 = vmmov 0   ;;  %v587_v5 = vmov 0.0  }
   0x4   :  { %533 = vmatprep.subr.bf16.mxu0 %v585_v3  ;;  %v534_v4 = vpack.c.bf16 %v39_v2, %v38_v1  ;;  %490 = vmatprep.mubr.msk.f32.mxu0 %vm586_vm0, %v587_v5  ;;  %v140_v6 = vld [vmem:[%s742_s3] sm:$0xff]  ;;  %v141_v7 = vld [vmem:[%s742_s3 + $0x8] sm:$0xff] }
   0x5   :  { %548 = vmatprep.subr.bf16.mxu1 %v585_v3  ;;  %496 = vmatprep.mubr.msk.f32.mxu1 %vm586_vm0, %v587_v5 }
   0x6   :  { %16 = vsyncpa [#allocation4], 0  ;;  %535 = vmatpush3.bf16.msra.mxu0 %v534_v4  ;;  %v35_v8 = vld [vmem:[%s739_s0] sm:$0xff]  ;;  %vm47_vm1 = vcmask 130048   ;;  %549 = vmatpush3.bf16.msra.mxu1 %v534_v4  ;;  %v37_v9 = vld [vmem:[%s739_s0 + $0x10] sm:$0xf]  ;;  %v537_v10 = vpack.c.bf16 %v141_v7, %v140_v6 }
   0x7   :  { %536 = vmatprep.subr.bf16.mxu1 %v585_v3  ;;  %542 = vmatprep.subr.bf16.mxu0 %v585_v3  ;;  %v36_v11 = vld [vmem:[%s739_s0 + $0x8] sm:$0xff]  ;;  %v142_v12 = vld [vmem:[%s742_s3 + $0x10] sm:$0xff]  ;;  %v143_v13 = vld [vmem:[%s742_s3 + $0x18] sm:$0xff]  ;;  %vm151_vm2 = vcmask 261120   ;;  %v588_v35 = vmov 0   ;;  %vm407_vm3 = vcmask 162816  }
   0x8   :  { %v540_v14 = vpack.c.bf16 %v143_v13, %v142_v12  ;;  %v244_v15 = vld [vmem:[%s744_s5] sm:$0xff]  ;;  %v245_v16 = vld [vmem:[%s744_s5 + $0x8] sm:$0xff]  ;;  %v246_v31 = vld [vmem:[%s744_s5 + $0x10] sm:$0xff]  ;;  %556 = vset.pattern.permute.xlu1 %v588_v35  ;;  %555 = vset.pattern.permute.xlu0 %v588_v35  ;;  %vm438_vm4 = vcmask 155648  }
   0x9   :  { %491 = vmatmul.mubr.msk.f32.vlgmr.msra.gmra.mrb[0].mxu0 %vm47_vm1, %v35_v8  ;;  %497 = vmatmul.mubr.msk.f32.vlgmr.msra.gmra.mrb[0].mxu1 %vm47_vm1, %v37_v9  ;;  %v543_v17 = vpack.c.bf16 %v245_v16, %v244_v15  ;;  %v454_v18 = vld [vmem:[%s741_s2] ss:$0 sm:$0xff]  ;;  %v247_v32 = vld [vmem:[%s744_s5 + $0x18] sm:$0xff]  ;;  %v381_v34 = vld [vmem:[%s746_s7 + $0x10] sm:$0xff] }
   0xa   :  { %493 = vmatprep.mubr.msk.f32.mxu0 %vm586_vm0, %v587_v5  ;;  %538 = vmatpush3.bf16.msra.mxu1 %v537_v10  ;;  %v546_v33 = vpack.c.bf16 %v247_v32, %v246_v31  ;;  %v382_v36 = vld [vmem:[%s746_s7 + $0x18] sm:$0xff]  ;;  %v458_v37 = vld [vmem:[%s743_s4] ss:$0 sm:$0xff]  ;;  %v380_v51 = vld [vmem:[%s746_s7 + $0x8] sm:$0xff] }
   0xb   :  { %539 = vmatprep.subr.bf16.mxu1 %v585_v3  ;;  %507 = vmatprep.mubr.msk.f32.mxu1 %vm586_vm0, %v587_v5  ;;  %v379_v50 = vld [vmem:[%s746_s7] sm:$0xff] }
   0xc   :  { %544 = vmatpush3.bf16.msra.mxu0 %v543_v17  ;;  %395 = vperm.xlu1 %556, %v381_v34   ;;  %v421_v52 = vld [vmem:[#allocation2] sm:$0x1] }
   0xd   :  { %494 = vmatmul.mubr.msk.f32.gmra.mrb[2].mxu0 %vm47_vm1, %v36_v11  ;;  %545 = vmatprep.subr.bf16.mxu0 %v585_v3  ;;  %v462_v53 = vld [vmem:[%s745_s6] ss:$0 sm:$0xff]  ;;  %s589_s6 = smov [#allocation3]  }
   0xe   :  { %524 = vmatprep.mubr.msk.f32.mxu0 %vm586_vm0, %v587_v5  ;;  %541 = vmatpush3.bf16.msra.mxu1 %v540_v14  ;;  %s446_s7 = sshll.u32 %s589_s6, 4  ;;  %s447_s7 = int_to_ptr.vmem [resolvable:$true] %s446_s7 }
   0xf   :  { %385 = vperm.xlu0 %555, %v379_v50   ;;  %s561_s21 = scalar_lea.vmem %s447_s7, 16  ;;  %s565_s22 = scalar_lea.vmem %s447_s7, 32 }
  0x10   :  { %547 = vmatpush3.bf16.msra.mxu0 %v546_v33  ;;  %400 = vperm.xlu1 %556, %v382_v36   ;;  %p562_p0 = scmp.ne.s32.totalorder %s447_s7, %s561_s21  ;;  %p566_p1 = scmp.lt.s32.totalorder %s447_s7, %s447_s7 }
  0x11   :  { %p567_p2 = scmp.lt.s32.totalorder %s565_s22, %s561_s21 }
  0x13   :  { %390 = vperm.xlu0 %555, %v380_v51   ;;  %p568_p3 = por %p567_p2, %p566_p1 }
  0x15   :  { %p569_p4 = pnand %p568_p3, %p562_p0 }
  0x17   :  { %424 = vperm.xlu0 %555, %v421_v52  }
  0x8b   :  { %v396_v2 = vpop.permute.xlu1 %395 }
  0x8e   :  { %v386_v4 = vpop.permute.xlu0 %385 }
  0x8f   :  { %v401_v3 = vpop.permute.xlu1 %400 }
  0x92   :  { %v391_v6 = vpop.permute.xlu0 %390 }
  0xdc   :  { %v123_v19 = vpop.f32.mrb[0].mxu0  ;;  %v133_v20 = vpop.f32.mrb[0].mxu1 }
  0xdd   :  { %v124_v21 = vadd.f32 %v454_v18, %v123_v19  ;;  %v492_v22 = vpop.f32.mrb[1].mxu0  ;;  %v498_v23 = vpop.f32.mrb[1].mxu1  ;;  %v134_v28 = vadd.f32 %v454_v18, %v133_v20  ;;  %v427_v20 = vlaneseq }
  0xdf   :  { %v137_v24 = vmax.f32 %v124_v21, 0.0  ;;  %v139_v30 = vmax.f32 %v134_v28, 0.0  ;;  %v428_v23 = vshrl.u32 %v427_v20, 7  ;;  %v425_v28 = vpop.permute.xlu0 %424 }
  0xe0   :  { %v128_v25 = vpop.f32.mrb[2].mxu0 }
  0xe1   :  { %v129_v26 = vadd.f32 %v454_v18, %v128_v25  ;;  %v495_v27 = vpop.f32.mrb[3].mxu0  ;;  %508 = vmatmul.mubr.msk.f32.vlgmr.msra.gmra.mrb[2].mxu1 %vm151_vm2, %v137_v24 }
  0xe2   :  { %510 = vmatprep.mubr.msk.f32.mxu1 %vm586_vm0, %v587_v5 }
  0xe3   :  { %v138_v29 = vmax.f32 %v129_v26, 0.0  ;;  %v429_v26 = vsub.s32 0, %v428_v23 }
  0xe5   :  { %511 = vmatmul.mubr.msk.f32.gmra.mrb[4].mxu1 %vm151_vm2, %v138_v29 }
  0xe6   :  { %513 = vmatprep.mubr.msk.f32.mxu1 %vm586_vm0, %v587_v5 }
  0xe9   :  { %514 = vmatmul.mubr.msk.f32.gmra.mrb[6].mxu1 %vm151_vm2, %v139_v30  ;;  %v430_v30 = vrot.slane %v425_v28, %v429_v26 }
 0x1b4   :  { %v227_v38 = vpop.f32.mrb[2].mxu1 }
 0x1b5   :  { %v228_v39 = vadd.f32 %v458_v37, %v227_v38  ;;  %v509_v40 = vpop.f32.mrb[3].mxu1 }
 0x1b7   :  { %v241_v41 = vmax.f32 %v228_v39, 0.0 }
 0x1b8   :  { %v232_v42 = vpop.f32.mrb[4].mxu1 }
 0x1b9   :  { %v233_v43 = vadd.f32 %v458_v37, %v232_v42  ;;  %v512_v44 = vpop.f32.mrb[5].mxu1  ;;  %525 = vmatmul.mubr.msk.f32.vlgmr.msra.gmra.mrb[4].mxu0 %vm151_vm2, %v241_v41 }
 0x1ba   :  { %527 = vmatprep.mubr.msk.f32.mxu0 %vm586_vm0, %v587_v5 }
 0x1bb   :  { %v242_v45 = vmax.f32 %v233_v43, 0.0 }
 0x1bc   :  { %v237_v46 = vpop.f32.mrb[6].mxu1 }
 0x1bd   :  { %v238_v47 = vadd.f32 %v458_v37, %v237_v46  ;;  %v515_v48 = vpop.f32.mrb[7].mxu1  ;;  %528 = vmatmul.mubr.msk.f32.gmra.mrb[6].mxu0 %vm151_vm2, %v242_v45 }
 0x1be   :  { %530 = vmatprep.mubr.msk.f32.mxu0 %vm586_vm0, %v587_v5 }
 0x1bf   :  { %v243_v49 = vmax.f32 %v238_v47, 0.0 }
 0x1c1   :  { %531 = vmatmul.mubr.msk.f32.gmra.mrb[8].mxu0 %vm151_vm2, %v243_v49 }
 0x28c   :  { %v330_v54 = vpop.f32.mrb[4].mxu0 }
 0x28d   :  { %v331_v55 = vadd.f32 %v462_v53, %v330_v54  ;;  %v526_v56 = vpop.f32.mrb[5].mxu0 }
 0x28f   :  { %v344_v57 = vmax.f32 %v331_v55, 0.0 }
 0x290   :  { %v335_v58 = vpop.f32.mrb[6].mxu0 }
 0x291   :  { %v336_v59 = vadd.f32 %v462_v53, %v335_v58  ;;  %347 = vxpose.xlu1.b32.start [1/3] (short) (narrow) %v344_v57, 32  ;;  %v529_v60 = vpop.f32.mrb[7].mxu0 }
 0x293   :  { %v345_v61 = vmax.f32 %v336_v59, 0.0 }
 0x294   :  { %v340_v62 = vpop.f32.mrb[8].mxu0 }
 0x295   :  { %v341_v63 = vadd.f32 %v462_v53, %v340_v62  ;;  %348 = vxpose.xlu1.b32.cont [2/3] (short) (narrow) %v345_v61, 32  ;;  %v532_v0 = vpop.f32.mrb[9].mxu0 }
 0x297   :  { %v346_v1 = vmax.f32 %v341_v63, 0.0 }
 0x299   :  { %349 = vxpose.xlu1.b32.end [3/3] (short) (narrow) %v346_v1, 32 }
 0x311   :  { %v363_v5 = vpop.trf.xlu1 }
 0x312   :  { %v403_v9 = vmul.f32 %v386_v4, %v363_v5 }
 0x314   :  { %v408_v13 = vsel %vm407_vm3, %v403_v9, 0.0 }
 0x315   :  { %v364_v7 = vpop.trf.xlu1 }
 0x316   :  { %v404_v8 = vmul.f32 %v391_v6, %v364_v7 }
 0x318   :  { %v409_v11 = vsel %vm407_vm3, %v404_v8, 0.0 }
 0x319   :  { %v365_v10 = vpop.trf.xlu1  ;;  %v410_v15 = vadd.f32 %v409_v11, %v408_v13 }
 0x31a   :  { %v405_v12 = vmul.f32 %v396_v2, %v365_v10 }
 0x31c   :  { %v411_v14 = vsel %vm407_vm3, %v405_v12, 0.0 }
 0x31d   :  { %v366_v16 = vpop.trf.xlu1  ;;  %v412_v18 = vadd.f32 %v411_v14, %v410_v15 }
 0x31e   :  { %v406_v17 = vmul.f32 %v401_v3, %v366_v16 }
 0x320   :  { %v413_v19 = vsel %vm407_vm3, %v406_v17, 0.0 }
 0x321   :  { %v414_v21 = vadd.f32 %v413_v19, %v412_v18 }
 0x323   :  { %v415_v22 = vrot.slane %v414_v21, 4 }
 0x325   :  { %v416_v24 = vadd.f32 %v415_v22, %v414_v21 }
 0x327   :  { %v417_v25 = vrot.slane %v416_v24, 2 }
 0x329   :  { %v418_v27 = vadd.f32 %v417_v25, %v416_v24 }
 0x32b   :  { %v419_v29 = vrot.slane %v418_v27, 1 }
 0x32d   :  { %v420_v31 = vadd.f32 %v419_v29, %v418_v27 }
 0x32f   :  { %v431_v32 = vadd.f32 %v430_v30, %v420_v31 }
 0x331   :  { %v466_v33 = vmul.f32 -1.442695, %v431_v32 }
 0x333   :  { %557 = vpow2.f32 %v466_v33 }
 0x33d   :  { %v558_v34 = vpop.eup %557 }
 0x33e   :  { %v435_v35 = vadd.f32 1.0, %v558_v34 }
 0x340   :  { %559 = vrcp.f32 %v435_v35 }
 0x34a   :  { %v560_v36 = vpop.eup %559 }
 0x34b   :  { %439 = vst.msk [vmem:[#allocation3] sm:$0x1] %vm438_vm4, %v560_v36 }
 0x34c   :  { %572 = shalt.err (!%p569_p4)
}
 0x34d   :  { %s573_s25 = scalar_lea.hbm %s748_s9, 16 }
 0x34e   :  { %p574_p5 = scmp.ne.s32.totalorder %s748_s9, %s573_s25  ;;  %p577_p6 = scmp.lt.u32.totalorder %s573_s25, %s748_s9 }
 0x350   :  { %p579_p7 = pnand %p577_p6, %p574_p5 }
 0x352   :  { %582 = shalt.err (!%p579_p7)
}
 0x353   :  { %449 = dma.vmem_to_hbm [thread:$0]  %s447_s7, 16, %s748_s9, [#allocation4]  }
 0x354   :  { %583 = dma.done.wait [#allocation4], 16  }
 0x355   :  { %584 = vsyncadd [#allocation4], 4294967280 }
 0x356   :  { %453 = vsyncpa [#allocation4], 1 }

</bundles_post_ra>
